<compile_context>
chip_gen: v6e
topology: v6e:2x2x1
jax: 0.10.0
libtpu: 0.0.40
codegen_flags: <defaults>
</compile_context>

<pallas_src>
import inspect
import math

import jax
import jax.numpy as jnp
from jax import lax
from jax.experimental import pallas as pl
from jax.experimental.pallas import tpu as pltpu

_INV_SQRT2 = 1.0 / math.sqrt(2.0)

# Static gate: single-buffer constant-index (resident) operands if this jax supports it.
try:
    _HAS_PIPELINE_MODE = "pipeline_mode" in inspect.signature(pl.BlockSpec).parameters
except (TypeError, ValueError):
    _HAS_PIPELINE_MODE = False


def _round_up(x, m):
    return ((x + m - 1) // m) * m


def _vmem_capacity_bytes():
    # v5e/v6e: 128 MiB per TensorCore, v7x: 64 MiB. Fall back to the smallest if the
    # trace-time query is unavailable.
    try:
        return int(pltpu.get_tpu_info().vmem_capacity_bytes)
    except Exception:
        return 64 << 20


def _gelu(h, approximate):
    if approximate:
        # tanh approximation -> EUP slot (useful once MXU/VALU-bound on v6e/v7x);
        # numerics differ slightly from torch's default exact GELU, so off by default.
        return jax.nn.gelu(h, approximate=True)
    # Exact erf-based GELU, matching torch.nn.GELU() default.
    return 0.5 * h * (1.0 + lax.erf(h * _INV_SQRT2))


# ---------------------------------------------------------------------------
# Kernels
# ---------------------------------------------------------------------------

def _make_resident_kernel(approximate_gelu):
    """Weights fully VMEM-resident; grid = (row tiles,). No accumulator scratch."""

    def kernel(x_ref, w1_ref, b1_ref, w2_ref, b2_ref, o_ref):
        # fc1: MXU matmul with f32 accumulation, bias + GELU in f32.
        h = jnp.dot(x_ref[...], w1_ref[...], preferred_element_type=jnp.float32)
        h = _gelu(h + b1_ref[...], approximate_gelu)
        # fc2: MXU matmul over the full hidden dim, bias, cast, store.
        out = jnp.dot(h.astype(w2_ref.dtype), w2_ref[...],
                      preferred_element_type=jnp.float32)
        o_ref[...] = (out + b2_ref[...]).astype(o_ref.dtype)
        # TODO(synk): nn.Dropout with p > 0 (training-mode RNG mask) is not implemented;
        # p = 0.0 (and eval mode) is the identity, so nothing to do here.

    return kernel


def _make_streaming_kernel(approximate_gelu):
    """Hidden dim streamed over grid axis 1 (reduction) with an f32 accumulator."""

    def kernel(x_ref, w1_ref, b1_ref, w2_ref, b2_ref, o_ref, acc_ref):
        h_idx = pl.program_id(1)

        @pl.when(h_idx == 0)
        def _():
            acc_ref[...] = jnp.zeros_like(acc_ref)

        h = jnp.dot(x_ref[...], w1_ref[...], preferred_element_type=jnp.float32)
        h = _gelu(h + b1_ref[...], approximate_gelu)
        acc_ref[...] += jnp.dot(h.astype(w2_ref.dtype), w2_ref[...],
                                preferred_element_type=jnp.float32)

        @pl.when(h_idx == pl.num_programs(1) - 1)
        def _():
            o_ref[...] = (acc_ref[...] + b2_ref[...]).astype(o_ref.dtype)

    return kernel


# ---------------------------------------------------------------------------
# pallas_call builders
# ---------------------------------------------------------------------------

def _resident_spec(shape, index_map):
    """Constant-index operand: one VMEM buffer is enough (no double-buffering)."""
    if _HAS_PIPELINE_MODE:
        return pl.BlockSpec(shape, index_map, pipeline_mode=pl.Buffered(1))
    return pl.BlockSpec(shape, index_map)


def _build_resident_call(*, M_p, Din_p, H_p, Dout_p, tm, out_dtype,
                         vmem_limit_bytes, cost, approximate_gelu):
    n_m = M_p // tm
    in_specs = [
        pl.BlockSpec((tm, Din_p), lambda i: (i, 0)),       # x row tile (pipelined)
        _resident_spec((Din_p, H_p), lambda i: (0, 0)),    # w1 (resident)
        _resident_spec((1, H_p), lambda i: (0, 0)),        # b1 (f32, resident)
        _resident_spec((H_p, Dout_p), lambda i: (0, 0)),   # w2 (resident)
        _resident_spec((1, Dout_p), lambda i: (0, 0)),     # b2 (f32, resident)
    ]
    out_specs = pl.BlockSpec((tm, Dout_p), lambda i: (i, 0))
    return pl.pallas_call(
        _make_resident_kernel(approximate_gelu),
        out_shape=jax.ShapeDtypeStruct((M_p, Dout_p), out_dtype),
        grid_spec=pltpu.PrefetchScalarGridSpec(
            num_scalar_prefetch=0,
            grid=(n_m,),
            in_specs=in_specs,
            out_specs=out_specs,
        ),
        compiler_params=pltpu.CompilerParams(
            dimension_semantics=("parallel",),
            vmem_limit_bytes=vmem_limit_bytes,
        ),
        cost_estimate=cost,
    )


def _build_streaming_call(*, M_p, Din_p, H_p, Dout_p, tm, th, out_dtype,
                          vmem_limit_bytes, cost, approximate_gelu):
    n_m = M_p // tm
    n_h = H_p // th
    in_specs = [
        pl.BlockSpec((tm, Din_p), lambda i, h: (i, 0)),    # x row tile
        pl.BlockSpec((Din_p, th), lambda i, h: (0, h)),    # w1 column block
        pl.BlockSpec((1, th), lambda i, h: (0, h)),        # b1 block (f32)
        pl.BlockSpec((th, Dout_p), lambda i, h: (h, 0)),   # w2 row block
        _resident_spec((1, Dout_p), lambda i, h: (0, 0)),  # b2 (f32, resident)
    ]
    out_specs = pl.BlockSpec((tm, Dout_p), lambda i, h: (i, 0))
    return pl.pallas_call(
        _make_streaming_kernel(approximate_gelu),
        out_shape=jax.ShapeDtypeStruct((M_p, Dout_p), out_dtype),
        grid_spec=pltpu.PrefetchScalarGridSpec(
            num_scalar_prefetch=0,
            grid=(n_m, n_h),
            in_specs=in_specs,
            out_specs=out_specs,
            scratch_shapes=[pltpu.VMEM((tm, Dout_p), jnp.float32)],  # f32 accumulator
        ),
        compiler_params=pltpu.CompilerParams(
            dimension_semantics=("parallel", "arbitrary"),
            vmem_limit_bytes=vmem_limit_bytes,
        ),
        cost_estimate=cost,
    )


# ---------------------------------------------------------------------------
# Public API
# ---------------------------------------------------------------------------

def prepare_mlp_params(w1, b1, w2, b2, *, compute_dtype=jnp.bfloat16):
    """Cast + lane-pad the weights ONCE (hoisted out of the per-call forward path).

    w1: (Din, H); b1: (H,); w2: (H, Dout); b2: (Dout,).
    Zero-padding is numerically exact (zero rows/cols contribute 0; GELU(0) = 0).
    """
    Din, H = w1.shape
    Dout = w2.shape[1]
    Din_p = _round_up(Din, 128)
    H_p = _round_up(H, 128)
    Dout_p = _round_up(Dout, 128)
    w1_p = jnp.pad(w1.astype(compute_dtype), ((0, Din_p - Din), (0, H_p - H)))
    w2_p = jnp.pad(w2.astype(compute_dtype), ((0, H_p - H), (0, Dout_p - Dout)))
    # Biases stay f32: added against f32 accumulators inside the kernel.
    b1_p = jnp.pad(b1.astype(jnp.float32), (0, H_p - H)).reshape(1, H_p)
    b2_p = jnp.pad(b2.astype(jnp.float32), (0, Dout_p - Dout)).reshape(1, Dout_p)
    return {
        "w1": w1_p, "b1": b1_p, "w2": w2_p, "b2": b2_p,
        "dims": (Din, H, Dout),
        "compute_dtype": jnp.dtype(compute_dtype),
    }


def _divisor_tiles(H_p):
    base = H_p // 128
    return sorted((128 * d for d in range(1, base + 1) if base % d == 0), reverse=True)


def mlp_pallas(x, params, *, out_dtype=None, approximate_gelu=False):
    """Apply the MLP. x: (..., Din). params: output of prepare_mlp_params()."""
    Din, H, Dout = params["dims"]
    cd = params["compute_dtype"]
    w1_p, b1_p, w2_p, b2_p = params["w1"], params["b1"], params["w2"], params["b2"]
    Din_p, H_p = w1_p.shape
    Dout_p = w2_p.shape[1]

    *lead, Din_x = x.shape
    assert Din_x == Din, f"expected last dim {Din}, got {Din_x}"
    M = 1
    for d in lead:
        M *= d
    out_dtype = jnp.dtype(out_dtype) if out_dtype is not None else jnp.dtype(x.dtype)

    csz = cd.itemsize
    osz = out_dtype.itemsize
    sub = 16 if csz < 4 else 8          # bf16 packs 16 rows per vreg -> keep tm >= 16

    cap = _vmem_capacity_bytes()
    budget = int(0.80 * cap)

    def row_tile(target):
        # Sublane-aligned row tile; keep >= 2 row tiles when there are enough rows so the
        # "parallel" axis can shard across v7x's two TensorCores.
        m_up = _round_up(M, sub)
        tm = min(target, m_up)
        if m_up >= 2 * sub and m_up // tm < 2:
            tm = _round_up(-(-m_up // 2), sub)
        return tm

    def resident_need(tm):
        wbytes = (Din_p * H_p + H_p * Dout_p) * csz
        if not _HAS_PIPELINE_MODE:
            wbytes *= 2                      # compiler would double-buffer by default
        return (2 * tm * Din_p * csz         # pipelined x tiles
                + wbytes                     # resident weights
                + (H_p + Dout_p) * 4         # biases (f32)
                + 2 * tm * Dout_p * osz      # pipelined out tiles
                + tm * H_p * (4 + csz)       # f32 hidden + bf16 recast intermediate
                + (4 << 20))                 # headroom for compiler temporaries

    def streaming_need(tm, th):
        return (2 * tm * Din_p * csz
                + 2 * (Din_p * th + th * Dout_p) * csz
                + 2 * th * 4 + Dout_p * 4
                + 2 * tm * Dout_p * osz
                + tm * Dout_p * 4            # f32 accumulator scratch
                + tm * th * (4 + csz)        # hidden intermediate
                + (4 << 20))

    flops = 2 * M * (Din * H + H * Dout)
    bytes_acc = (M * Din * csz + (Din * H + H * Dout) * csz
                 + (H + Dout) * 4 + M * Dout * osz)
    cost = pl.CostEstimate(flops=flops, transcendentals=M * H,
                           bytes_accessed=bytes_acc)

    # Prefer fully VMEM-resident weights (single weight DMA per call); shrink the row tile
    # if needed, fall back to H-streaming only when the weights themselves don't fit.
    tm = row_tile(512)
    while resident_need(tm) > budget and tm > sub:
        tm = max(sub, _round_up(tm // 2, sub))
    use_resident = resident_need(tm) <= budget

    vmem_cap = int(0.85 * cap)

    if use_resident:
        M_p = _round_up(M, tm)
        x2d = jnp.pad(x.reshape(M, Din).astype(cd),
                      ((0, M_p - M), (0, Din_p - Din)))
        need = resident_need(tm)
        vmem_limit = int(min(max(need + need // 4, 32 << 20), vmem_cap))
        out2d = _build_resident_call(
            M_p=M_p, Din_p=Din_p, H_p=H_p, Dout_p=Dout_p, tm=tm,
            out_dtype=out_dtype, vmem_limit_bytes=vmem_limit, cost=cost,
            approximate_gelu=approximate_gelu,
        )(x2d, w1_p, b1_p, w2_p, b2_p)
    else:
        tm = row_tile(256)
        th = 128
        for cand in _divisor_tiles(H_p):
            if cand <= 2048 and streaming_need(tm, cand) <= budget:
                th = cand
                break
        M_p = _round_up(M, tm)
        x2d = jnp.pad(x.reshape(M, Din).astype(cd),
                      ((0, M_p - M), (0, Din_p - Din)))
        need = streaming_need(tm, th)
        vmem_limit = int(min(max(need + need // 4, 32 << 20), vmem_cap))
        out2d = _build_streaming_call(
            M_p=M_p, Din_p=Din_p, H_p=H_p, Dout_p=Dout_p, tm=tm, th=th,
            out_dtype=out_dtype, vmem_limit_bytes=vmem_limit, cost=cost,
            approximate_gelu=approximate_gelu,
        )(x2d, w1_p, b1_p, w2_p, b2_p)

    return out2d[:M, :Dout].reshape(*lead, Dout)


def mlp_pallas_full(x, w1, b1, w2, b2, **kwargs):
    """Convenience wrapper: prepares (casts/pads) the weights and applies the MLP."""
    return mlp_pallas(x, prepare_mlp_params(w1, b1, w2, b2), **kwargs)


# ---------------------------------------------------------------------------
# Self-test
# ---------------------------------------------------------------------------

if __name__ == "__main__":
    # Small shapes consistent with the module (tokens of dim in_features).
    B, N = 2, 8
    in_features = 32
    hidden_features = 128
    out_features = 32

    key = jax.random.PRNGKey(0)
    k_x, k_w1, k_b1, k_w2, k_b2 = jax.random.split(key, 5)

    x = jax.random.normal(k_x, (B, N, in_features), dtype=jnp.float32)
    # torch Linear stores (out, in); here weights are already (in, out).
    w1 = jax.random.normal(k_w1, (in_features, hidden_features), dtype=jnp.float32) * 0.05
    b1 = jax.random.normal(k_b1, (hidden_features,), dtype=jnp.float32) * 0.05
    w2 = jax.random.normal(k_w2, (hidden_features, out_features), dtype=jnp.float32) * 0.05
    b2 = jax.random.normal(k_b2, (out_features,), dtype=jnp.float32) * 0.05

    # Weight preprocessing hoisted out of the forward path (done once).
    params = prepare_mlp_params(w1, b1, w2, b2)

    out = mlp_pallas(x, params)
    out = jax.block_until_ready(out)
    assert out.shape == (B, N, out_features)

    # Reference with the same precision policy as the kernel
    # (bf16 matmul inputs, f32 accumulation / bias / exact erf GELU).
    cd = jnp.bfloat16
    x2 = x.reshape(-1, in_features).astype(cd)
    h_ref = jnp.dot(x2, w1.astype(cd), preferred_element_type=jnp.float32) + b1
    h_ref = 0.5 * h_ref * (1.0 + lax.erf(h_ref * _INV_SQRT2))
    ref = jnp.dot(h_ref.astype(cd), w2.astype(cd),
                  preferred_element_type=jnp.float32) + b2
    ref = ref.reshape(B, N, out_features).astype(out.dtype)

    err = jnp.max(jnp.abs(out.astype(jnp.float32) - ref.astype(jnp.float32)))
    assert float(err) < 1e-2, f"mismatch vs reference, max abs err = {float(err)}"

    print("KERNEL_OK")
</pallas_src>

<mosaic_0001>
module attributes {stable_mosaic.version = 11 : i64} {
  func.func @kernel(%arg0: i32, %arg1: memref<16x128xbf16, #tpu.memory_space<vmem>>, %arg2: memref<128x128xbf16, #tpu.memory_space<vmem>>, %arg3: memref<1x128xf32, #tpu.memory_space<vmem>>, %arg4: memref<128x128xbf16, #tpu.memory_space<vmem>>, %arg5: memref<1x128xf32, #tpu.memory_space<vmem>>, %arg6: memref<16x128xf32, #tpu.memory_space<vmem>>) attributes {dimension_semantics = [#tpu.dimension_semantics<parallel>], iteration_bounds = array<i64: 1>, scalar_prefetch = 0 : i64, scratch_operands = 0 : i64, tpu.core_type = #tpu.core_type<tc>, window_params = [{transform_indices = @transform_0, window_bounds = array<i64: 16, 128>}, {pipeline_mode = #tpu.pipeline_mode<synchronous>, transform_indices = @transform_1, window_bounds = array<i64: 128, 128>}, {pipeline_mode = #tpu.pipeline_mode<synchronous>, transform_indices = @transform_2, window_bounds = array<i64: 1, 128>}, {pipeline_mode = #tpu.pipeline_mode<synchronous>, transform_indices = @transform_3, window_bounds = array<i64: 128, 128>}, {pipeline_mode = #tpu.pipeline_mode<synchronous>, transform_indices = @transform_4, window_bounds = array<i64: 1, 128>}, {transform_indices = @transform_5, window_bounds = array<i64: 16, 128>}]} {
    %c0 = arith.constant 0 : index
    %c0_0 = arith.constant 0 : index
    %0 = vector.load %arg1[%c0, %c0_0] : memref<16x128xbf16, #tpu.memory_space<vmem>>, vector<16x128xbf16>
    %c0_1 = arith.constant 0 : index
    %c0_2 = arith.constant 0 : index
    %1 = vector.load %arg2[%c0_1, %c0_2] : memref<128x128xbf16, #tpu.memory_space<vmem>>, vector<128x128xbf16>
    %cst = arith.constant dense<0.000000e+00> : vector<16x128xf32>
    %2 = tpu.matmul %0, %1, %cst {dimension_numbers = #tpu.dot_dimension_numbers<[1], [0], [0], [1], [0, 0, 1, 1], [], []>} : vector<16x128xbf16>, vector<128x128xbf16>, vector<16x128xf32> -> vector<16x128xf32>
    %c0_3 = arith.constant 0 : index
    %c0_4 = arith.constant 0 : index
    %3 = vector.load %arg3[%c0_3, %c0_4] : memref<1x128xf32, #tpu.memory_space<vmem>>, vector<1x128xf32>
    %4 = vector.broadcast %3 : vector<1x128xf32> to vector<16x128xf32>
    %5 = arith.addf %2, %4 : vector<16x128xf32>
    %cst_5 = arith.constant 5.000000e-01 : f32
    %6 = vector.broadcast %cst_5 : f32 to vector<16x128xf32>
    %7 = arith.mulf %6, %5 : vector<16x128xf32>
    %cst_6 = arith.constant 0.707106769 : f32
    %8 = vector.broadcast %cst_6 : f32 to vector<16x128xf32>
    %9 = arith.mulf %5, %8 : vector<16x128xf32>
    %10 = math.erf %9 : vector<16x128xf32>
    %cst_7 = arith.constant 1.000000e+00 : f32
    %11 = vector.broadcast %cst_7 : f32 to vector<16x128xf32>
    %12 = arith.addf %11, %10 : vector<16x128xf32>
    %13 = arith.mulf %7, %12 : vector<16x128xf32>
    %14 = arith.truncf %13 : vector<16x128xf32> to vector<16x128xbf16>
    %c0_8 = arith.constant 0 : index
    %c0_9 = arith.constant 0 : index
    %15 = vector.load %arg4[%c0_8, %c0_9] : memref<128x128xbf16, #tpu.memory_space<vmem>>, vector<128x128xbf16>
    %cst_10 = arith.constant dense<0.000000e+00> : vector<16x128xf32>
    %16 = tpu.matmul %14, %15, %cst_10 {dimension_numbers = #tpu.dot_dimension_numbers<[1], [0], [0], [1], [0, 0, 1, 1], [], []>} : vector<16x128xbf16>, vector<128x128xbf16>, vector<16x128xf32> -> vector<16x128xf32>
    %c0_11 = arith.constant 0 : index
    %c0_12 = arith.constant 0 : index
    %17 = vector.load %arg5[%c0_11, %c0_12] : memref<1x128xf32, #tpu.memory_space<vmem>>, vector<1x128xf32>
    %18 = vector.broadcast %17 : vector<1x128xf32> to vector<16x128xf32>
    %19 = arith.addf %16, %18 : vector<16x128xf32>
    %c0_13 = arith.constant 0 : index
    %c0_14 = arith.constant 0 : index
    %20 = vector.load %arg6[%c0_13, %c0_14] : memref<16x128xf32, #tpu.memory_space<vmem>>, vector<16x128xf32>
    tpu.vector_store %arg6[%c0_13, %c0_14], %19 {strides = array<i32>} : memref<16x128xf32, #tpu.memory_space<vmem>>, vector<16x128xf32>,
    return
  }
  func.func @transform_0(%arg0: i32) -> (i32, i32) {
    %c0_i32 = arith.constant 0 : i32
    %c0_i32_0 = arith.constant 0 : i32
    return %arg0, %c0_i32 : i32, i32
  }
  func.func @transform_1(%arg0: i32) -> (i32, i32) {
    %c0_i32 = arith.constant 0 : i32
    %c0_i32_0 = arith.constant 0 : i32
    %c0_i32_1 = arith.constant 0 : i32
    return %c0_i32, %c0_i32_0 : i32, i32
  }
  func.func @transform_2(%arg0: i32) -> (i32, i32) {
    %c0_i32 = arith.constant 0 : i32
    %c0_i32_0 = arith.constant 0 : i32
    %c0_i32_1 = arith.constant 0 : i32
    return %c0_i32, %c0_i32_0 : i32, i32
  }
  func.func @transform_3(%arg0: i32) -> (i32, i32) {
    %c0_i32 = arith.constant 0 : i32
    %c0_i32_0 = arith.constant 0 : i32
    %c0_i32_1 = arith.constant 0 : i32
    return %c0_i32, %c0_i32_0 : i32, i32
  }
  func.func @transform_4(%arg0: i32) -> (i32, i32) {
    %c0_i32 = arith.constant 0 : i32
    %c0_i32_0 = arith.constant 0 : i32
    %c0_i32_1 = arith.constant 0 : i32
    return %c0_i32, %c0_i32_0 : i32, i32
  }
  func.func @transform_5(%arg0: i32) -> (i32, i32) {
    %c0_i32 = arith.constant 0 : i32
    %c0_i32_0 = arith.constant 0 : i32
    return %arg0, %c0_i32 : i32, i32
  }
}

</mosaic_0001>

<bundles_post_ra>
// kernel: tpu_custom_call.1
= control target key start
LH: loop header
LB: loop body
LE: loop exit
PB: predicated region body
PF: predicated region fallthrough
CT: control target
= control target key end

     0   :  { %10 = vsyncpa [#allocation3], 0  ;;  %s578_s0 = inlined_call_operand.hbm [shape: bf16[16,128], index: 0, kind: input, shape index: {}]   ;;  %s579_s1 = inlined_call_operand.hbm [shape: bf16[128,128], index: 1, kind: input, shape index: {}]   ;;  %s580_s2 = inlined_call_operand.vmem [shape: f32[1,128], index: 2, kind: input, shape index: {}]   ;;  %s581_s3 = inlined_call_operand.hbm [shape: bf16[128,128], index: 3, kind: input, shape index: {}]   ;;  %s582_s4 = inlined_call_operand.vmem [shape: f32[1,128], index: 4, kind: input, shape index: {}]   ;;  %s583_s5 = inlined_call_operand.hbm [shape: f32[16,128], index: 5, kind: output, shape index: {}]  }
   0x1   :  { %11 = vsyncpa [#allocation6], 0 }
   0x2   :  { %12 = vsyncpa [#allocation4], 0  ;;  %s520_s18 = smov [#allocation5]   ;;  %s521_s20 = smov [#allocation2]  }
   0x3   :  { %s30_s19 = sshll.u32 %s520_s18, 4  ;;  %s18_s21 = sshll.u32 %s521_s20, 4  ;;  %s31_s19 = int_to_ptr.vmem [resolvable:$true] %s30_s19  ;;  %s19_s21 = int_to_ptr.vmem [resolvable:$true] %s18_s21 }
   0x4   :  { %s442_s22 = scalar_lea.vmem %s31_s19, 1024  ;;  %p447_p1 = scmp.lt.s32.totalorder %s31_s19, %s31_s19 }
   0x5   :  { %p443_p0 = scmp.ne.s32.totalorder %s31_s19, %s442_s22  ;;  %p448_p2 = scmp.lt.s32.totalorder %s442_s22, %s442_s22 }
   0x7   :  { %p449_p3 = por %p448_p2, %p447_p1 }
   0x9   :  { %p450_p4 = pnand %p449_p3, %p443_p0 }
   0xb   :  { %453 = shalt.err (!%p450_p4)
}
   0xc   :  { %s522_s23 = smov 64   ;;  %s523_s24 = smov 4  }
   0xd   :  { %36 = dma.hbm_to_vmem [thread:$0]  %s579_s1, 1024, %s31_s19, [#allocation6], %s522_s23, %s522_s23, %s523_s24  }
   0xe   :  { %s462_s27 = scalar_lea.vmem %s19_s21, 128  ;;  %p467_p6 = scmp.lt.s32.totalorder %s19_s21, %s19_s21 }
   0xf   :  { %p463_p5 = scmp.ne.s32.totalorder %s19_s21, %s462_s27  ;;  %p468_p7 = scmp.lt.s32.totalorder %s462_s27, %s462_s27 }
  0x11   :  { %p469_p8 = por %p468_p7, %p467_p6 }
  0x13   :  { %p470_p9 = pnand %p469_p8, %p463_p5 }
  0x15   :  { %473 = shalt.err (!%p470_p9)
}
  0x16   :  { %24 = dma.hbm_to_vmem [thread:$0]  %s578_s0, 128, %s19_s21, [#allocation3], %s522_s23, %s522_s23, %s523_s24  }
  0x17   :  { %s524_s30 = smov [#allocation7]  }
  0x18   :  { %s44_s6 = sshll.u32 %s524_s30, 4  ;;  %s45_s6 = int_to_ptr.vmem [resolvable:$true] %s44_s6 }
  0x19   :  { %s482_s7 = scalar_lea.vmem %s45_s6, 1024  ;;  %p487_p11 = scmp.lt.s32.totalorder %s45_s6, %s45_s6 }
  0x1a   :  { %p483_p10 = scmp.ne.s32.totalorder %s45_s6, %s482_s7  ;;  %p488_p12 = scmp.lt.s32.totalorder %s482_s7, %s482_s7 }
  0x1c   :  { %p489_p13 = por %p488_p12, %p487_p11 }
  0x1e   :  { %p490_p0 = pnand %p489_p13, %p483_p10 }
  0x20   :  { %493 = shalt.err (!%p490_p0)
}
  0x21   :  { %50 = dma.hbm_to_vmem [thread:$0]  %s581_s3, 1024, %s45_s6, [#allocation6], %s522_s23, %s522_s23, %s523_s24  }
  0x22   :  { %514 = dma.done.wait [#allocation3], 128  }
  0x23   :  { %515 = vsyncadd [#allocation3], 4294967168 }
  0x24   :  { %516 = dma.done.wait [#allocation6], 2048  }
  0x25   :  { %517 = vsyncadd [#allocation6], 4294965248  ;;  %v525_v0 = vmov 0.0   ;;  %vm526_vm0 = vmmov 0   ;;  %v413_v1 = vld [vmem:[#allocation5 + $0x38] sm:$0xff]   ;;  %v414_v2 = vld [vmem:[#allocation5 + $0x30] sm:$0xff]  }
  0x26   :  { %363 = vmatprep.subr.bf16.mxu0 %v525_v0  ;;  %379 = vmatprep.mubr.msk.bf16.mxu0 %vm526_vm0, %v525_v0  ;;  %v415_v3 = vld [vmem:[#allocation5 + $0x28] sm:$0xff]   ;;  %v422_v4 = vld [vmem:[#allocation7 + $0x38] sm:$0xff]   ;;  %v416_v5 = vld [vmem:[#allocation5 + $0x20] sm:$0xff]   ;;  %s527_s10 = smov [#allocation8]  }
  0x27   :  { %383 = vmatprep.subr.bf16.mxu1 %v525_v0  ;;  %399 = vmatprep.mubr.msk.bf16.mxu1 %vm526_vm0, %v525_v0  ;;  %v417_v6 = vld [vmem:[#allocation5 + $0x18] sm:$0xff]   ;;  %v418_v7 = vld [vmem:[#allocation5 + $0x10] sm:$0xff]   ;;  %v419_v8 = vld [vmem:[#allocation5 + $0x8] sm:$0xff]   ;;  %s313_s11 = sshll.u32 %s527_s10, 4  ;;  %s314_s11 = int_to_ptr.vmem [resolvable:$true] %s313_s11 }
  0x28   :  { %364 = vmatpush3.bf16.msra.mxu0 %v413_v1  ;;  %384 = vmatpush3.bf16.msra.mxu1 %v422_v4  ;;  %v420_v9 = vld [vmem:[#allocation5] sm:$0xff]   ;;  %v421_v10 = vld [vmem:[#allocation2] sm:$0xff]   ;;  %v423_v11 = vld [vmem:[#allocation7 + $0x30] sm:$0xff]   ;;  %s494_s12 = scalar_lea.vmem %s314_s11, 256  ;;  %p499_p2 = scmp.lt.s32.totalorder %s314_s11, %s314_s11 }
  0x29   :  { %365 = vmatprep.subr.bf16.mxu0 %v525_v0  ;;  %385 = vmatprep.subr.bf16.mxu1 %v525_v0  ;;  %v424_v12 = vld [vmem:[#allocation7 + $0x28] sm:$0xff]   ;;  %v425_v13 = vld [vmem:[#allocation7 + $0x20] sm:$0xff]   ;;  %v426_v14 = vld [vmem:[#allocation7 + $0x18] sm:$0xff]   ;;  %p495_p1 = scmp.ne.s32.totalorder %s314_s11, %s494_s12  ;;  %p500_p3 = scmp.lt.s32.totalorder %s494_s12, %s494_s12 }
  0x2a   :  { %v427_v15 = vld [vmem:[#allocation7 + $0x10] sm:$0xff]   ;;  %v428_v16 = vld [vmem:[#allocation7 + $0x8] sm:$0xff]   ;;  %v429_v17 = vld [vmem:[#allocation7] sm:$0xff]  }
  0x2b   :  { %v326_v18 = vld [vmem:[%s580_s2] ss:$0 sm:$0xff]  ;;  %p501_p4 = por %p500_p3, %p499_p2 }
  0x2c   :  { %366 = vmatpush3.bf16.msra.mxu0 %v414_v2  ;;  %386 = vmatpush3.bf16.msra.mxu1 %v423_v11  ;;  %v336_v36 = vld [vmem:[%s582_s4] ss:$0 sm:$0xff] }
  0x2d   :  { %367 = vmatprep.subr.bf16.mxu0 %v525_v0  ;;  %387 = vmatprep.subr.bf16.mxu1 %v525_v0  ;;  %p502_p5 = pnand %p501_p4, %p495_p1 }
  0x30   :  { %368 = vmatpush3.bf16.msra.mxu0 %v415_v3  ;;  %388 = vmatpush3.bf16.msra.mxu1 %v424_v12 }
  0x31   :  { %369 = vmatprep.subr.bf16.mxu0 %v525_v0  ;;  %389 = vmatprep.subr.bf16.mxu1 %v525_v0 }
  0x34   :  { %370 = vmatpush3.bf16.msra.mxu0 %v416_v5  ;;  %390 = vmatpush3.bf16.msra.mxu1 %v425_v13 }
  0x35   :  { %371 = vmatprep.subr.bf16.mxu0 %v525_v0  ;;  %391 = vmatprep.subr.bf16.mxu1 %v525_v0 }
  0x38   :  { %372 = vmatpush3.bf16.msra.mxu0 %v417_v6  ;;  %392 = vmatpush3.bf16.msra.mxu1 %v426_v14 }
  0x39   :  { %373 = vmatprep.subr.bf16.mxu0 %v525_v0  ;;  %393 = vmatprep.subr.bf16.mxu1 %v525_v0 }
  0x3c   :  { %374 = vmatpush3.bf16.msra.mxu0 %v418_v7  ;;  %394 = vmatpush3.bf16.msra.mxu1 %v427_v15 }
  0x3d   :  { %375 = vmatprep.subr.bf16.mxu0 %v525_v0  ;;  %395 = vmatprep.subr.bf16.mxu1 %v525_v0 }
  0x40   :  { %376 = vmatpush3.bf16.msra.mxu0 %v419_v8  ;;  %396 = vmatpush3.bf16.msra.mxu1 %v428_v16 }
  0x41   :  { %377 = vmatprep.subr.bf16.mxu0 %v525_v0  ;;  %397 = vmatprep.subr.bf16.mxu1 %v525_v0 }
  0x44   :  { %378 = vmatpush3.bf16.msra.mxu0 %v420_v9  ;;  %398 = vmatpush3.bf16.msra.mxu1 %v429_v17 }
  0x47   :  { %380 = vmatmul.mubr.bf16.vlgmr.msra.gmra.mxu0 %v421_v10 }
 0x107   :  { %v176_v19 = vpop.f32.mrf.mxu0 }
 0x108   :  { %v177_v20 = vadd.f32 %v326_v18, %v176_v19 }
 0x109   :  { %v381_v21 = vpop.f32.mrf.mxu0 }
 0x10a   :  { %v185_v22 = vmul.f32 0.70710677, %v177_v20  ;;  %v183_v30 = vmul.f32 0.5, %v177_v20 }
 0x10b   :  { %v179_v23 = vpop.f32.mrf.mxu0 }
 0x10c   :  { %430 = verf.f32 %v185_v22  ;;  %v180_v24 = vadd.f32 %v326_v18, %v179_v23 }
 0x10d   :  { %v382_v25 = vpop.f32.mrf.mxu0 }
 0x10e   :  { %v186_v26 = vmul.f32 0.70710677, %v180_v24  ;;  %v184_v31 = vmul.f32 0.5, %v180_v24 }
 0x110   :  { %432 = verf.f32 %v186_v26 }
 0x119   :  { %v431_v27 = vpop.eup %430 }
 0x11a   :  { %v189_v28 = vadd.f32 1.0, %v431_v27 }
 0x11c   :  { %v191_v33 = vmul.f32 %v189_v28, %v183_v30 }
 0x11d   :  { %v433_v29 = vpop.eup %432 }
 0x11e   :  { %v190_v32 = vadd.f32 1.0, %v433_v29 }
 0x120   :  { %v192_v34 = vmul.f32 %v190_v32, %v184_v31 }
 0x122   :  { %v193_v35 = vpack.c.bf16 %v192_v34, %v191_v33 }
 0x124   :  { %400 = vmatmul.mubr.bf16.vlgmr.msra.gmra.mxu1 %v193_v35 }
 0x1e4   :  { %v299_v37 = vpop.f32.mrf.mxu1 }
 0x1e5   :  { %v300_v38 = vadd.f32 %v336_v36, %v299_v37 }
 0x1e6   :  { %v401_v39 = vpop.f32.mrf.mxu1 }
 0x1e7   :  { %306 = vst [vmem:[#allocation8] sm:$0xff] %v300_v38 }
 0x1e8   :  { %v302_v40 = vpop.f32.mrf.mxu1 }
 0x1e9   :  { %v303_v41 = vadd.f32 %v336_v36, %v302_v40 }
 0x1ea   :  { %v402_v42 = vpop.f32.mrf.mxu1 }
 0x1eb   :  { %307 = vst [vmem:[#allocation8 + $0x8] sm:$0xff] %v303_v41 }
 0x1ec   :  { %505 = shalt.err (!%p502_p5)
}
 0x1ed   :  { %s528_s13 = smov 128   ;;  %s529_s4 = smov 8  }
 0x1ee   :  { %319 = dma.vmem_to_hbm [thread:$0]  %s314_s11, 256, %s583_s5, [#allocation4], %s528_s13, %s528_s13, %s529_s4  }
 0x1ef   :  { %518 = dma.done.wait [#allocation4], 256  }
 0x1f0   :  { %519 = vsyncadd [#allocation4], 4294967040 }
 0x1f1   :  { %323 = vsyncpa [#allocation3], 1 }
 0x1f2   :  { %324 = vsyncpa [#allocation6], 1 }
 0x1f3   :  { %325 = vsyncpa [#allocation4], 1 }

</bundles_post_ra>
